<compile_context>
chip_gen: v7x
topology: tpu7x:2x2x1
jax: 0.10.0
libtpu: 0.0.40
codegen_flags: <defaults>
</compile_context>

<pallas_src>
import functools
import math

import jax
import jax.numpy as jnp
from jax import lax
from jax.experimental import pallas as pl
from jax.experimental.pallas import tpu as pltpu

SMOOTH = 1.0
_LANES = 128
_DEFAULT_BLOCK_BYTES = 4 << 20   # combined x+y bytes streamed per grid step
_MAX_BLOCK_BYTES = 12 << 20      # keeps 2x double-buffering v7x-safe (<~28 MiB)


def _dice_kernel(x_ref, y_ref, dc_ref, inter_acc, pred_acc, gt_acc,
                 *, num_classes, rows_per_tile, rows_rem, smooth):
    """Streaming soft-dice statistics over one (batch, spatial-tile) grid cell.

    x_ref : (1, C, R, 128) predictions, native dtype
    y_ref : (1, 1, R, 128) integer labels, native int dtype
    dc_ref: (1, C, 1)      per-(batch, class) dice, written on the last tile only
    *_acc : (C, 128)       lane-wide f32 running sums, resident across the
                           spatial-tile (reduction) grid axis
    """
    t = pl.program_id(1)
    n_t = pl.num_programs(1)

    @pl.when(t == 0)
    def _init():
        inter_acc[...] = jnp.zeros_like(inter_acc)
        pred_acc[...] = jnp.zeros_like(pred_acc)
        gt_acc[...] = jnp.zeros_like(gt_acc)

    def accumulate(valid):
        y = y_ref[0, 0].astype(jnp.int32)                       # (R, 128)
        # Small unrolled loop over classes (nnU-Net C is 2-5): each class slab
        # is a fully dense (R, 128) tile, so the VPU works on full vregs.
        for c in range(num_classes):
            xc = x_ref[0, c].astype(jnp.float32)                # (R, 128)
            m = y == c                                          # (R, 128) bool
            if valid is not None:
                xc = jnp.where(valid, xc, 0.0)
                m = jnp.logical_and(m, valid)
            # Reduce over the sublane (row) axis only; the cross-lane reduce is
            # deferred to the finalize step (runs once per batch element).
            inter_acc[c] += jnp.sum(jnp.where(m, xc, 0.0), axis=0)
            pred_acc[c] += jnp.sum(xc, axis=0)
            gt_acc[c] += jnp.sum(m.astype(jnp.float32), axis=0)

    if rows_rem == 0:
        # Hot path: every tile is full -> no masking work at all.
        accumulate(None)
    else:
        # Only the ragged last tile pays the validity iota/compare/select;
        # rows >= rows_rem there are Pallas out-of-bounds block padding.
        @pl.when(t != n_t - 1)
        def _full():
            accumulate(None)

        @pl.when(t == n_t - 1)
        def _ragged():
            row = lax.broadcasted_iota(jnp.int32, (rows_per_tile, _LANES), 0)
            accumulate(row < rows_rem)

    @pl.when(t == n_t - 1)
    def _finalize():
        inter = jnp.sum(inter_acc[...], axis=1, keepdims=True)  # (C, 1)
        pred = jnp.sum(pred_acc[...], axis=1, keepdims=True)
        gt = jnp.sum(gt_acc[...], axis=1, keepdims=True)
        # dc = (2*I + smooth) / clip(sum_gt + sum_pred + smooth, min=1e-8)
        denom = jnp.maximum(gt + pred + smooth, 1e-8)
        dc_ref[0] = (2.0 * inter + smooth) / denom


def memory_efficient_soft_dice_loss(x, y, *, block_bytes=_DEFAULT_BLOCK_BYTES,
                                    rows_per_tile=None):
    """x: (B, C, *spatial) float predictions (f32/bf16 stream in native dtype),
    y: (B, *spatial) integer labels (int8/int32 stream in native dtype).
    Returns scalar -mean(dice) with the module defaults (no nonlin, do_bg=True,
    batch_dice=False, smooth=1.0, no loss_mask)."""
    B, C = int(x.shape[0]), int(x.shape[1])
    hw = math.prod(x.shape[2:])
    assert y.shape[0] == B and math.prod(y.shape[1:]) == hw

    x_flat = x.reshape(B, C, hw)
    y_flat = y.reshape(B, 1, hw)

    # Lane-dense spatial layout: HW -> (S, 128).  nnU-Net patch volumes are
    # essentially always a multiple of 128; otherwise pad once (x with 0, y
    # with the out-of-range label C) so the pad contributes nothing.
    pad = (-hw) % _LANES
    if pad:
        x_flat = jnp.pad(x_flat, ((0, 0), (0, 0), (0, pad)))
        y_flat = jnp.pad(y_flat, ((0, 0), (0, 0), (0, pad)), constant_values=C)
    S = (hw + pad) // _LANES
    x_dense = x_flat.reshape(B, C, S, _LANES)
    y_dense = y_flat.reshape(B, 1, S, _LANES)

    # Tile sizing from a VMEM byte budget: a few MiB per grid step hits the
    # measured HBM-roofline sweet spot while double-buffered blocks stay far
    # below v5e's 16 MiB default scoped VMEM and v7x's 32 MiB scoped limit.
    x_bytes = x.dtype.itemsize
    y_bytes = y.dtype.itemsize
    row_bytes = _LANES * (C * x_bytes + y_bytes)
    if rows_per_tile is None:
        budget = min(int(block_bytes), _MAX_BLOCK_BYTES)
        rows_per_tile = max(budget // row_bytes, 8) // 8 * 8
    rows_per_tile = int(min(rows_per_tile, S))
    if rows_per_tile < S:
        assert rows_per_tile % 8 == 0, "rows_per_tile must be a multiple of 8"
    n_tiles = pl.cdiv(S, rows_per_tile)
    rows_rem = S % rows_per_tile

    kernel = functools.partial(
        _dice_kernel, num_classes=C, rows_per_tile=rows_per_tile,
        rows_rem=rows_rem, smooth=SMOOTH)

    cp_kwargs = dict(dimension_semantics=("parallel", "arbitrary"))
    vmem_need = 2 * rows_per_tile * row_bytes + 3 * 8 * _LANES * 4 + (1 << 20)
    if vmem_need > (12 << 20):
        # Only if the caller forces very large blocks: raise v5e's 16 MiB
        # default scoped window, capped below v7x's ~32 MiB scoped limit.
        cp_kwargs["vmem_limit_bytes"] = min(int(vmem_need), 28 << 20)

    dc = pl.pallas_call(
        kernel,
        out_shape=jax.ShapeDtypeStruct((B, C, 1), jnp.float32),
        grid_spec=pltpu.PrefetchScalarGridSpec(
            num_scalar_prefetch=0,
            grid=(B, n_tiles),
            in_specs=[
                pl.BlockSpec((1, C, rows_per_tile, _LANES),
                             lambda b, t: (b, 0, t, 0)),
                pl.BlockSpec((1, 1, rows_per_tile, _LANES),
                             lambda b, t: (b, 0, t, 0)),
            ],
            # Output block index is invariant along t -> it stays resident in
            # VMEM across the reduction axis, written to HBM once per b.
            out_specs=pl.BlockSpec((1, C, 1), lambda b, t: (b, 0, 0)),
            scratch_shapes=[
                pltpu.VMEM((C, _LANES), jnp.float32),
                pltpu.VMEM((C, _LANES), jnp.float32),
                pltpu.VMEM((C, _LANES), jnp.float32),
            ],
        ),
        compiler_params=pltpu.CompilerParams(**cp_kwargs),
    )(x_dense, y_dense)

    dc = dc[..., 0]                    # (B, C)
    # batch_dice=False -> per-sample dice; do_bg=True -> keep all channels.
    return -jnp.mean(dc)


def _reference_loss(x, y):
    """Pure-JAX reference mirroring the PyTorch module (defaults, no mask)."""
    C = x.shape[1]
    axes = tuple(range(2, x.ndim))
    y_onehot = jax.nn.one_hot(y, C, axis=1, dtype=jnp.float32)
    xf = x.astype(jnp.float32)
    intersect = jnp.sum(xf * y_onehot, axis=axes)
    sum_pred = jnp.sum(xf, axis=axes)
    sum_gt = jnp.sum(y_onehot, axis=axes)
    dc = (2.0 * intersect + SMOOTH) / jnp.maximum(sum_gt + sum_pred + SMOOTH, 1e-8)
    return -jnp.mean(dc)


if __name__ == "__main__":
    key = jax.random.PRNGKey(0)
    k1, k2, k3, k4 = jax.random.split(key, 4)

    # Case 1: 128-aligned spatial extent, forced small tiles so the streaming
    # accumulation loop runs over several reduction steps (S=32 rows, R=8 -> 4).
    B, C, H, W = 2, 4, 64, 64
    x1 = jax.random.normal(k1, (B, C, H, W), dtype=jnp.float32)
    y1 = jax.random.randint(k2, (B, H, W), 0, C, dtype=jnp.int32)
    out1 = jax.block_until_ready(memory_efficient_soft_dice_loss(x1, y1, rows_per_tile=8))
    ref1 = jax.block_until_ready(_reference_loss(x1, y1))
    assert jnp.allclose(out1, ref1, atol=1e-5, rtol=1e-5), (out1, ref1)

    # Case 1b: same inputs through the default VMEM-budget-derived tiling.
    out1b = jax.block_until_ready(memory_efficient_soft_dice_loss(x1, y1))
    assert jnp.allclose(out1b, ref1, atol=1e-5, rtol=1e-5), (out1b, ref1)

    # Case 2: non-128-divisible spatial extent (40*40=1600 -> padded to 1664,
    # S=13, R=8 -> ragged last tile) with bf16 preds and int8 labels streamed
    # in their native dtypes.
    B2, C2, H2, W2 = 2, 3, 40, 40
    x2 = jax.random.normal(k3, (B2, C2, H2, W2), dtype=jnp.bfloat16)
    y2 = jax.random.randint(k4, (B2, H2, W2), 0, C2, dtype=jnp.int32).astype(jnp.int8)
    out2 = jax.block_until_ready(memory_efficient_soft_dice_loss(x2, y2, rows_per_tile=8))
    ref2 = jax.block_until_ready(_reference_loss(x2, y2))
    assert jnp.allclose(out2, ref2, atol=1e-4, rtol=1e-4), (out2, ref2)

    print("KERNEL_OK")
</pallas_src>

<mosaic_0001>
module attributes {stable_mosaic.version = 11 : i64} {
  func.func @_dice_kernel(%arg0: i32, %arg1: i32, %arg2: memref<1x4x8x128xf32, #tpu.memory_space<vmem>>, %arg3: memref<1x1x8x128xi32, #tpu.memory_space<vmem>>, %arg4: memref<1x4x1xf32, #tpu.memory_space<vmem>>, %arg5: memref<4x128xf32, #tpu.memory_space<vmem>>, %arg6: memref<4x128xf32, #tpu.memory_space<vmem>>, %arg7: memref<4x128xf32, #tpu.memory_space<vmem>>) attributes {dimension_semantics = [#tpu.dimension_semantics<parallel>, #tpu.dimension_semantics<arbitrary>], iteration_bounds = array<i64: 2, 4>, scalar_prefetch = 0 : i64, scratch_operands = 3 : i64, tpu.core_type = #tpu.core_type<tc>, window_params = [{transform_indices = @transform_0, window_bounds = array<i64: 1, 4, 8, 128>}, {transform_indices = @transform_1, window_bounds = array<i64: 1, 1, 8, 128>}, {transform_indices = @transform_2, window_bounds = array<i64: 1, 4, 1>}]} {
    %c0_i32 = arith.constant 0 : i32
    %0 = arith.cmpi eq, %arg1, %c0_i32 : i32
    %1 = arith.extui %0 : i1 to i32
    %c0_i32_0 = arith.constant 0 : i32
    %2 = arith.cmpi ne, %1, %c0_i32_0 : i32
    scf.if %2 {
      %cst_83 = arith.constant 0.000000e+00 : f32
      %124 = vector.broadcast %cst_83 : f32 to vector<4x128xf32>
      %c0_84 = arith.constant 0 : index
      %c0_85 = arith.constant 0 : index
      %125 = vector.load %arg5[%c0_84, %c0_85] : memref<4x128xf32, #tpu.memory_space<vmem>>, vector<4x128xf32>
      tpu.vector_store %arg5[%c0_84, %c0_85], %124 {strides = array<i32>} : memref<4x128xf32, #tpu.memory_space<vmem>>, vector<4x128xf32>,
      %cst_86 = arith.constant 0.000000e+00 : f32
      %126 = vector.broadcast %cst_86 : f32 to vector<4x128xf32>
      %c0_87 = arith.constant 0 : index
      %c0_88 = arith.constant 0 : index
      %127 = vector.load %arg6[%c0_87, %c0_88] : memref<4x128xf32, #tpu.memory_space<vmem>>, vector<4x128xf32>
      tpu.vector_store %arg6[%c0_87, %c0_88], %126 {strides = array<i32>} : memref<4x128xf32, #tpu.memory_space<vmem>>, vector<4x128xf32>,
      %cst_89 = arith.constant 0.000000e+00 : f32
      %128 = vector.broadcast %cst_89 : f32 to vector<4x128xf32>
      %c0_90 = arith.constant 0 : index
      %c0_91 = arith.constant 0 : index
      %129 = vector.load %arg7[%c0_90, %c0_91] : memref<4x128xf32, #tpu.memory_space<vmem>>, vector<4x128xf32>
      tpu.vector_store %arg7[%c0_90, %c0_91], %128 {strides = array<i32>} : memref<4x128xf32, #tpu.memory_space<vmem>>, vector<4x128xf32>,
    } else {
    }
    %c0 = arith.constant 0 : index
    %c0_1 = arith.constant 0 : index
    %c0_2 = arith.constant 0 : index
    %c0_3 = arith.constant 0 : index
    %3 = vector.load %arg3[%c0, %c0_1, %c0_2, %c0_3] : memref<1x1x8x128xi32, #tpu.memory_space<vmem>>, vector<1x1x8x128xi32>
    %4 = vector.shape_cast %3 : vector<1x1x8x128xi32> to vector<8x128xi32>
    %c0_4 = arith.constant 0 : index
    %c0_5 = arith.constant 0 : index
    %c0_6 = arith.constant 0 : index
    %c0_7 = arith.constant 0 : index
    %5 = vector.load %arg2[%c0_4, %c0_5, %c0_6, %c0_7] : memref<1x4x8x128xf32, #tpu.memory_space<vmem>>, vector<1x1x8x128xf32>
    %6 = vector.shape_cast %5 : vector<1x1x8x128xf32> to vector<8x128xf32>
    %c0_i32_8 = arith.constant 0 : i32
    %7 = vector.broadcast %c0_i32_8 : i32 to vector<8x128xi32>
    %8 = arith.cmpi eq, %4, %7 : vector<8x128xi32>
    %c0_9 = arith.constant 0 : index
    %c0_10 = arith.constant 0 : index
    %9 = vector.load %arg5[%c0_9, %c0_10] : memref<4x128xf32, #tpu.memory_space<vmem>>, vector<1x128xf32>
    %10 = vector.shape_cast %9 : vector<1x128xf32> to vector<128xf32>
    %cst = arith.constant 0.000000e+00 : f32
    %11 = vector.broadcast %cst : f32 to vector<8x128xf32>
    %12 = arith.select %8, %6, %11 : vector<8x128xi1>, vector<8x128xf32>
    %cst_11 = arith.constant dense<0.000000e+00> : vector<128xf32>
    %13 = vector.multi_reduction <add>, %12, %cst_11 [0] : vector<8x128xf32> to vector<128xf32>
    %14 = arith.addf %10, %13 : vector<128xf32>
    %c0_12 = arith.constant 0 : index
    %c0_13 = arith.constant 0 : index
    %15 = vector.load %arg5[%c0_12, %c0_13] : memref<4x128xf32, #tpu.memory_space<vmem>>, vector<1x128xf32>
    %16 = vector.shape_cast %15 : vector<1x128xf32> to vector<128xf32>
    %17 = vector.shape_cast %14 : vector<128xf32> to vector<1x128xf32>
    tpu.vector_store %arg5[%c0_12, %c0_13], %17 {strides = array<i32>} : memref<4x128xf32, #tpu.memory_space<vmem>>, vector<1x128xf32>,
    %c0_14 = arith.constant 0 : index
    %c0_15 = arith.constant 0 : index
    %18 = vector.load %arg6[%c0_14, %c0_15] : memref<4x128xf32, #tpu.memory_space<vmem>>, vector<1x128xf32>
    %19 = vector.shape_cast %18 : vector<1x128xf32> to vector<128xf32>
    %cst_16 = arith.constant dense<0.000000e+00> : vector<128xf32>
    %20 = vector.multi_reduction <add>, %6, %cst_16 [0] : vector<8x128xf32> to vector<128xf32>
    %21 = arith.addf %19, %20 : vector<128xf32>
    %c0_17 = arith.constant 0 : index
    %c0_18 = arith.constant 0 : index
    %22 = vector.load %arg6[%c0_17, %c0_18] : memref<4x128xf32, #tpu.memory_space<vmem>>, vector<1x128xf32>
    %23 = vector.shape_cast %22 : vector<1x128xf32> to vector<128xf32>
    %24 = vector.shape_cast %21 : vector<128xf32> to vector<1x128xf32>
    tpu.vector_store %arg6[%c0_17, %c0_18], %24 {strides = array<i32>} : memref<4x128xf32, #tpu.memory_space<vmem>>, vector<1x128xf32>,
    %c0_19 = arith.constant 0 : index
    %c0_20 = arith.constant 0 : index
    %25 = vector.load %arg7[%c0_19, %c0_20] : memref<4x128xf32, #tpu.memory_space<vmem>>, vector<1x128xf32>
    %26 = vector.shape_cast %25 : vector<1x128xf32> to vector<128xf32>
    %27 = arith.extui %8 : vector<8x128xi1> to vector<8x128xi32>
    %28 = arith.sitofp %27 : vector<8x128xi32> to vector<8x128xf32>
    %cst_21 = arith.constant dense<0.000000e+00> : vector<128xf32>
    %29 = vector.multi_reduction <add>, %28, %cst_21 [0] : vector<8x128xf32> to vector<128xf32>
    %30 = arith.addf %26, %29 : vector<128xf32>
    %c0_22 = arith.constant 0 : index
    %c0_23 = arith.constant 0 : index
    %31 = vector.load %arg7[%c0_22, %c0_23] : memref<4x128xf32, #tpu.memory_space<vmem>>, vector<1x128xf32>
    %32 = vector.shape_cast %31 : vector<1x128xf32> to vector<128xf32>
    %33 = vector.shape_cast %30 : vector<128xf32> to vector<1x128xf32>
    tpu.vector_store %arg7[%c0_22, %c0_23], %33 {strides = array<i32>} : memref<4x128xf32, #tpu.memory_space<vmem>>, vector<1x128xf32>,
    %c0_24 = arith.constant 0 : index
    %c1 = arith.constant 1 : index
    %c0_25 = arith.constant 0 : index
    %c0_26 = arith.constant 0 : index
    %34 = vector.load %arg2[%c0_24, %c1, %c0_25, %c0_26] : memref<1x4x8x128xf32, #tpu.memory_space<vmem>>, vector<1x1x8x128xf32>
    %35 = vector.shape_cast %34 : vector<1x1x8x128xf32> to vector<8x128xf32>
    %c1_i32 = arith.constant 1 : i32
    %36 = vector.broadcast %c1_i32 : i32 to vector<8x128xi32>
    %37 = arith.cmpi eq, %4, %36 : vector<8x128xi32>
    %c1_27 = arith.constant 1 : index
    %c0_28 = arith.constant 0 : index
    %38 = vector.load %arg5[%c1_27, %c0_28] : memref<4x128xf32, #tpu.memory_space<vmem>>, vector<1x128xf32>
    %39 = vector.shape_cast %38 : vector<1x128xf32> to vector<128xf32>
    %cst_29 = arith.constant 0.000000e+00 : f32
    %40 = vector.broadcast %cst_29 : f32 to vector<8x128xf32>
    %41 = arith.select %37, %35, %40 : vector<8x128xi1>, vector<8x128xf32>
    %cst_30 = arith.constant dense<0.000000e+00> : vector<128xf32>
    %42 = vector.multi_reduction <add>, %41, %cst_30 [0] : vector<8x128xf32> to vector<128xf32>
    %43 = arith.addf %39, %42 : vector<128xf32>
    %c1_31 = arith.constant 1 : index
    %c0_32 = arith.constant 0 : index
    %44 = vector.load %arg5[%c1_31, %c0_32] : memref<4x128xf32, #tpu.memory_space<vmem>>, vector<1x128xf32>
    %45 = vector.shape_cast %44 : vector<1x128xf32> to vector<128xf32>
    %46 = vector.shape_cast %43 : vector<128xf32> to vector<1x128xf32>
    tpu.vector_store %arg5[%c1_31, %c0_32], %46 {strides = array<i32>} : memref<4x128xf32, #tpu.memory_space<vmem>>, vector<1x128xf32>,
    %c1_33 = arith.constant 1 : index
    %c0_34 = arith.constant 0 : index
    %47 = vector.load %arg6[%c1_33, %c0_34] : memref<4x128xf32, #tpu.memory_space<vmem>>, vector<1x128xf32>
    %48 = vector.shape_cast %47 : vector<1x128xf32> to vector<128xf32>
    %cst_35 = arith.constant dense<0.000000e+00> : vector<128xf32>
    %49 = vector.multi_reduction <add>, %35, %cst_35 [0] : vector<8x128xf32> to vector<128xf32>
    %50 = arith.addf %48, %49 : vector<128xf32>
    %c1_36 = arith.constant 1 : index
    %c0_37 = arith.constant 0 : index
    %51 = vector.load %arg6[%c1_36, %c0_37] : memref<4x128xf32, #tpu.memory_space<vmem>>, vector<1x128xf32>
    %52 = vector.shape_cast %51 : vector<1x128xf32> to vector<128xf32>
    %53 = vector.shape_cast %50 : vector<128xf32> to vector<1x128xf32>
    tpu.vector_store %arg6[%c1_36, %c0_37], %53 {strides = array<i32>} : memref<4x128xf32, #tpu.memory_space<vmem>>, vector<1x128xf32>,
    %c1_38 = arith.constant 1 : index
    %c0_39 = arith.constant 0 : index
    %54 = vector.load %arg7[%c1_38, %c0_39] : memref<4x128xf32, #tpu.memory_space<vmem>>, vector<1x128xf32>
    %55 = vector.shape_cast %54 : vector<1x128xf32> to vector<128xf32>
    %56 = arith.extui %37 : vector<8x128xi1> to vector<8x128xi32>
    %57 = arith.sitofp %56 : vector<8x128xi32> to vector<8x128xf32>
    %cst_40 = arith.constant dense<0.000000e+00> : vector<128xf32>
    %58 = vector.multi_reduction <add>, %57, %cst_40 [0] : vector<8x128xf32> to vector<128xf32>
    %59 = arith.addf %55, %58 : vector<128xf32>
    %c1_41 = arith.constant 1 : index
    %c0_42 = arith.constant 0 : index
    %60 = vector.load %arg7[%c1_41, %c0_42] : memref<4x128xf32, #tpu.memory_space<vmem>>, vector<1x128xf32>
    %61 = vector.shape_cast %60 : vector<1x128xf32> to vector<128xf32>
    %62 = vector.shape_cast %59 : vector<128xf32> to vector<1x128xf32>
    tpu.vector_store %arg7[%c1_41, %c0_42], %62 {strides = array<i32>} : memref<4x128xf32, #tpu.memory_space<vmem>>, vector<1x128xf32>,
    %c0_43 = arith.constant 0 : index
    %c2 = arith.constant 2 : index
    %c0_44 = arith.constant 0 : index
    %c0_45 = arith.constant 0 : index
    %63 = vector.load %arg2[%c0_43, %c2, %c0_44, %c0_45] : memref<1x4x8x128xf32, #tpu.memory_space<vmem>>, vector<1x1x8x128xf32>
    %64 = vector.shape_cast %63 : vector<1x1x8x128xf32> to vector<8x128xf32>
    %c2_i32 = arith.constant 2 : i32
    %65 = vector.broadcast %c2_i32 : i32 to vector<8x128xi32>
    %66 = arith.cmpi eq, %4, %65 : vector<8x128xi32>
    %c2_46 = arith.constant 2 : index
    %c0_47 = arith.constant 0 : index
    %67 = vector.load %arg5[%c2_46, %c0_47] : memref<4x128xf32, #tpu.memory_space<vmem>>, vector<1x128xf32>
    %68 = vector.shape_cast %67 : vector<1x128xf32> to vector<128xf32>
    %cst_48 = arith.constant 0.000000e+00 : f32
    %69 = vector.broadcast %cst_48 : f32 to vector<8x128xf32>
    %70 = arith.select %66, %64, %69 : vector<8x128xi1>, vector<8x128xf32>
    %cst_49 = arith.constant dense<0.000000e+00> : vector<128xf32>
    %71 = vector.multi_reduction <add>, %70, %cst_49 [0] : vector<8x128xf32> to vector<128xf32>
    %72 = arith.addf %68, %71 : vector<128xf32>
    %c2_50 = arith.constant 2 : index
    %c0_51 = arith.constant 0 : index
    %73 = vector.load %arg5[%c2_50, %c0_51] : memref<4x128xf32, #tpu.memory_space<vmem>>, vector<1x128xf32>
    %74 = vector.shape_cast %73 : vector<1x128xf32> to vector<128xf32>
    %75 = vector.shape_cast %72 : vector<128xf32> to vector<1x128xf32>
    tpu.vector_store %arg5[%c2_50, %c0_51], %75 {strides = array<i32>} : memref<4x128xf32, #tpu.memory_space<vmem>>, vector<1x128xf32>,
    %c2_52 = arith.constant 2 : index
    %c0_53 = arith.constant 0 : index
    %76 = vector.load %arg6[%c2_52, %c0_53] : memref<4x128xf32, #tpu.memory_space<vmem>>, vector<1x128xf32>
    %77 = vector.shape_cast %76 : vector<1x128xf32> to vector<128xf32>
    %cst_54 = arith.constant dense<0.000000e+00> : vector<128xf32>
    %78 = vector.multi_reduction <add>, %64, %cst_54 [0] : vector<8x128xf32> to vector<128xf32>
    %79 = arith.addf %77, %78 : vector<128xf32>
    %c2_55 = arith.constant 2 : index
    %c0_56 = arith.constant 0 : index
    %80 = vector.load %arg6[%c2_55, %c0_56] : memref<4x128xf32, #tpu.memory_space<vmem>>, vector<1x128xf32>
    %81 = vector.shape_cast %80 : vector<1x128xf32> to vector<128xf32>
    %82 = vector.shape_cast %79 : vector<128xf32> to vector<1x128xf32>
    tpu.vector_store %arg6[%c2_55, %c0_56], %82 {strides = array<i32>} : memref<4x128xf32, #tpu.memory_space<vmem>>, vector<1x128xf32>,
    %c2_57 = arith.constant 2 : index
    %c0_58 = arith.constant 0 : index
    %83 = vector.load %arg7[%c2_57, %c0_58] : memref<4x128xf32, #tpu.memory_space<vmem>>, vector<1x128xf32>
    %84 = vector.shape_cast %83 : vector<1x128xf32> to vector<128xf32>
    %85 = arith.extui %66 : vector<8x128xi1> to vector<8x128xi32>
    %86 = arith.sitofp %85 : vector<8x128xi32> to vector<8x128xf32>
    %cst_59 = arith.constant dense<0.000000e+00> : vector<128xf32>
    %87 = vector.multi_reduction <add>, %86, %cst_59 [0] : vector<8x128xf32> to vector<128xf32>
    %88 = arith.addf %84, %87 : vector<128xf32>
    %c2_60 = arith.constant 2 : index
    %c0_61 = arith.constant 0 : index
    %89 = vector.load %arg7[%c2_60, %c0_61] : memref<4x128xf32, #tpu.memory_space<vmem>>, vector<1x128xf32>
    %90 = vector.shape_cast %89 : vector<1x128xf32> to vector<128xf32>
    %91 = vector.shape_cast %88 : vector<128xf32> to vector<1x128xf32>
    tpu.vector_store %arg7[%c2_60, %c0_61], %91 {strides = array<i32>} : memref<4x128xf32, #tpu.memory_space<vmem>>, vector<1x128xf32>,
    %c0_62 = arith.constant 0 : index
    %c3 = arith.constant 3 : index
    %c0_63 = arith.constant 0 : index
    %c0_64 = arith.constant 0 : index
    %92 = vector.load %arg2[%c0_62, %c3, %c0_63, %c0_64] : memref<1x4x8x128xf32, #tpu.memory_space<vmem>>, vector<1x1x8x128xf32>
    %93 = vector.shape_cast %92 : vector<1x1x8x128xf32> to vector<8x128xf32>
    %c3_i32 = arith.constant 3 : i32
    %94 = vector.broadcast %c3_i32 : i32 to vector<8x128xi32>
    %95 = arith.cmpi eq, %4, %94 : vector<8x128xi32>
    %c3_65 = arith.constant 3 : index
    %c0_66 = arith.constant 0 : index
    %96 = vector.load %arg5[%c3_65, %c0_66] : memref<4x128xf32, #tpu.memory_space<vmem>>, vector<1x128xf32>
    %97 = vector.shape_cast %96 : vector<1x128xf32> to vector<128xf32>
    %cst_67 = arith.constant 0.000000e+00 : f32
    %98 = vector.broadcast %cst_67 : f32 to vector<8x128xf32>
    %99 = arith.select %95, %93, %98 : vector<8x128xi1>, vector<8x128xf32>
    %cst_68 = arith.constant dense<0.000000e+00> : vector<128xf32>
    %100 = vector.multi_reduction <add>, %99, %cst_68 [0] : vector<8x128xf32> to vector<128xf32>
    %101 = arith.addf %97, %100 : vector<128xf32>
    %c3_69 = arith.constant 3 : index
    %c0_70 = arith.constant 0 : index
    %102 = vector.load %arg5[%c3_69, %c0_70] : memref<4x128xf32, #tpu.memory_space<vmem>>, vector<1x128xf32>
    %103 = vector.shape_cast %102 : vector<1x128xf32> to vector<128xf32>
    %104 = vector.shape_cast %101 : vector<128xf32> to vector<1x128xf32>
    tpu.vector_store %arg5[%c3_69, %c0_70], %104 {strides = array<i32>} : memref<4x128xf32, #tpu.memory_space<vmem>>, vector<1x128xf32>,
    %c3_71 = arith.constant 3 : index
    %c0_72 = arith.constant 0 : index
    %105 = vector.load %arg6[%c3_71, %c0_72] : memref<4x128xf32, #tpu.memory_space<vmem>>, vector<1x128xf32>
    %106 = vector.shape_cast %105 : vector<1x128xf32> to vector<128xf32>
    %cst_73 = arith.constant dense<0.000000e+00> : vector<128xf32>
    %107 = vector.multi_reduction <add>, %93, %cst_73 [0] : vector<8x128xf32> to vector<128xf32>
    %108 = arith.addf %106, %107 : vector<128xf32>
    %c3_74 = arith.constant 3 : index
    %c0_75 = arith.constant 0 : index
    %109 = vector.load %arg6[%c3_74, %c0_75] : memref<4x128xf32, #tpu.memory_space<vmem>>, vector<1x128xf32>
    %110 = vector.shape_cast %109 : vector<1x128xf32> to vector<128xf32>
    %111 = vector.shape_cast %108 : vector<128xf32> to vector<1x128xf32>
    tpu.vector_store %arg6[%c3_74, %c0_75], %111 {strides = array<i32>} : memref<4x128xf32, #tpu.memory_space<vmem>>, vector<1x128xf32>,
    %c3_76 = arith.constant 3 : index
    %c0_77 = arith.constant 0 : index
    %112 = vector.load %arg7[%c3_76, %c0_77] : memref<4x128xf32, #tpu.memory_space<vmem>>, vector<1x128xf32>
    %113 = vector.shape_cast %112 : vector<1x128xf32> to vector<128xf32>
    %114 = arith.extui %95 : vector<8x128xi1> to vector<8x128xi32>
    %115 = arith.sitofp %114 : vector<8x128xi32> to vector<8x128xf32>
    %cst_78 = arith.constant dense<0.000000e+00> : vector<128xf32>
    %116 = vector.multi_reduction <add>, %115, %cst_78 [0] : vector<8x128xf32> to vector<128xf32>
    %117 = arith.addf %113, %116 : vector<128xf32>
    %c3_79 = arith.constant 3 : index
    %c0_80 = arith.constant 0 : index
    %118 = vector.load %arg7[%c3_79, %c0_80] : memref<4x128xf32, #tpu.memory_space<vmem>>, vector<1x128xf32>
    %119 = vector.shape_cast %118 : vector<1x128xf32> to vector<128xf32>
    %120 = vector.shape_cast %117 : vector<128xf32> to vector<1x128xf32>
    tpu.vector_store %arg7[%c3_79, %c0_80], %120 {strides = array<i32>} : memref<4x128xf32, #tpu.memory_space<vmem>>, vector<1x128xf32>,
    %c3_i32_81 = arith.constant 3 : i32
    %121 = arith.cmpi eq, %arg1, %c3_i32_81 : i32
    %122 = arith.extui %121 : i1 to i32
    %c0_i32_82 = arith.constant 0 : i32
    %123 = arith.cmpi ne, %122, %c0_i32_82 : i32
    scf.if %123 {
      %c0_83 = arith.constant 0 : index
      %c0_84 = arith.constant 0 : index
      %124 = vector.load %arg5[%c0_83, %c0_84] : memref<4x128xf32, #tpu.memory_space<vmem>>, vector<4x128xf32>
      %cst_85 = arith.constant dense<0.000000e+00> : vector<4xf32>
      %125 = vector.multi_reduction <add>, %124, %cst_85 [1] : vector<4x128xf32> to vector<4xf32>
      %126 = vector.shape_cast %125 : vector<4xf32> to vector<4x1xf32>
      %c0_86 = arith.constant 0 : index
      %c0_87 = arith.constant 0 : index
      %127 = vector.load %arg6[%c0_86, %c0_87] : memref<4x128xf32, #tpu.memory_space<vmem>>, vector<4x128xf32>
      %cst_88 = arith.constant dense<0.000000e+00> : vector<4xf32>
      %128 = vector.multi_reduction <add>, %127, %cst_88 [1] : vector<4x128xf32> to vector<4xf32>
      %129 = vector.shape_cast %128 : vector<4xf32> to vector<4x1xf32>
      %c0_89 = arith.constant 0 : index
      %c0_90 = arith.constant 0 : index
      %130 = vector.load %arg7[%c0_89, %c0_90] : memref<4x128xf32, #tpu.memory_space<vmem>>, vector<4x128xf32>
      %cst_91 = arith.constant dense<0.000000e+00> : vector<4xf32>
      %131 = vector.multi_reduction <add>, %130, %cst_91 [1] : vector<4x128xf32> to vector<4xf32>
      %132 = vector.shape_cast %131 : vector<4xf32> to vector<4x1xf32>
      %133 = arith.addf %132, %129 : vector<4x1xf32>
      %cst_92 = arith.constant 1.000000e+00 : f32
      %134 = vector.broadcast %cst_92 : f32 to vector<4x1xf32>
      %135 = arith.addf %133, %134 : vector<4x1xf32>
      %cst_93 = arith.constant 9.99999993E-9 : f32
      %136 = vector.broadcast %cst_93 : f32 to vector<4x1xf32>
      %137 = arith.maximumf %135, %136 : vector<4x1xf32>
      %cst_94 = arith.constant 2.000000e+00 : f32
      %138 = vector.broadcast %cst_94 : f32 to vector<4x1xf32>
      %139 = arith.mulf %138, %126 : vector<4x1xf32>
      %cst_95 = arith.constant 1.000000e+00 : f32
      %140 = vector.broadcast %cst_95 : f32 to vector<4x1xf32>
      %141 = arith.addf %139, %140 : vector<4x1xf32>
      %142 = arith.divf %141, %137 : vector<4x1xf32>
      %c0_96 = arith.constant 0 : index
      %c0_97 = arith.constant 0 : index
      %c0_98 = arith.constant 0 : index
      %143 = vector.load %arg4[%c0_96, %c0_97, %c0_98] : memref<1x4x1xf32, #tpu.memory_space<vmem>>, vector<1x4x1xf32>
      %144 = vector.shape_cast %143 : vector<1x4x1xf32> to vector<4x1xf32>
      %145 = vector.shape_cast %142 : vector<4x1xf32> to vector<1x4x1xf32>
      tpu.vector_store %arg4[%c0_96, %c0_97, %c0_98], %145 {strides = array<i32>} : memref<1x4x1xf32, #tpu.memory_space<vmem>>, vector<1x4x1xf32>,
    } else {
    }
    return
  }
  func.func @transform_0(%arg0: i32, %arg1: i32) -> (i32, i32, i32, i32) {
    %c0_i32 = arith.constant 0 : i32
    %c0_i32_0 = arith.constant 0 : i32
    %c0_i32_1 = arith.constant 0 : i32
    return %arg0, %c0_i32, %arg1, %c0_i32_0 : i32, i32, i32, i32
  }
  func.func @transform_1(%arg0: i32, %arg1: i32) -> (i32, i32, i32, i32) {
    %c0_i32 = arith.constant 0 : i32
    %c0_i32_0 = arith.constant 0 : i32
    %c0_i32_1 = arith.constant 0 : i32
    return %arg0, %c0_i32, %arg1, %c0_i32_0 : i32, i32, i32, i32
  }
  func.func @transform_2(%arg0: i32, %arg1: i32) -> (i32, i32, i32) {
    %c0_i32 = arith.constant 0 : i32
    %c0_i32_0 = arith.constant 0 : i32
    %c0_i32_1 = arith.constant 0 : i32
    return %arg0, %c0_i32, %c0_i32_0 : i32, i32, i32
  }
}

</mosaic_0001>

<bundles_post_ra>
// kernel: tpu_custom_call.1
= control target key start
LH: loop header
LB: loop body
LE: loop exit
PB: predicated region body
PF: predicated region fallthrough
CT: control target
= control target key end

     0   :  { %s964_s0 = inlined_call_operand.hbm [shape: f32[2,4,32,128], index: 0, kind: input, shape index: {}]   ;;  %s965_s1 = inlined_call_operand.hbm [shape: s32[2,1,32,128], index: 1, kind: input, shape index: {}]   ;;  %s966_s2 = inlined_call_operand.vmem [shape: f32[2,4,1], index: 2, kind: output, shape index: {}]  }
   0x1   :  { %969 = sst [smem:[#allocation12_spill]] %s964_s0 }
   0x2   :  { %7 = vsyncpa [#allocation6], 0 }
   0x3   :  { %9 = vsyncpa [#allocation6 + $0x1], 0 }
   0x4   :  { %10 = vsyncpa [#allocation8], 0 }
   0x5   :  { %12 = vsyncpa [#allocation8 + $0x1], 0  ;;  %s748_s9 = smov 0   ;;  %s750_s10 = smov 0  }
   0x6   :  { %s752_s11 = smov 0   ;;  %s754_s12 = smov 0  }
   0x7   :  { %s756_s13 = smov 0   ;;  %s758_s14 = smov 0  }
   0x8   :  { %s760_s15 = smov 0   ;;  %s762_s16 = smov 0  }
   0x9 LB: > { %s486_s17 = sadd.s32 4294967295, %s724_s16   ;;  %s27_s18 = sadd.s32 1, %s716_s14  ;;  %s724_s16 = sphi %s762_s16, %s18_s16   ;;  %s720_s15 = sphi %s760_s15, %s985_s15   ;;  %s716_s14 = sphi %s758_s14, %s984_s14   ;;  %s712_s13 = sphi %s756_s13, %s983_s13   ;;  %s708_s12 = sphi %s754_s12, %s982_s12   ;;  %s704_s11 = sphi %s752_s11, %s981_s11   ;;  %s700_s10 = sphi %s750_s10, %s980_s10   ;;  %s696_s9 = sphi %s748_s9, %s979_s9  }
   0xa   : > { %p28_p0 = scmp.ge.s32.totalorder %s27_s18, 4  ;;  %s30_s19 = sadd.s32 1, %s720_s15 }
   0xb   : > { %s39_s20 = sadd.s32 1, %s704_s11  ;;  %p46_p1 = scmp.ne.s32.totalorder %s704_s11, %s700_s10 }
   0xc   : > { %s987_s18 = smov (%p28_p0, %s27_s18), 0  ;;  %s989_s19 = smov (!%p28_p0, %s30_s19), %s720_s15 }
   0xd   : > { %s35_s21 = ssub.s32 %s716_s14, %s987_s18  ;;  %p47_p2 = scmp.eq.s32.totalorder %s724_s16, 0 }
   0xe   : > { %p32_p3 = scmp.ge.s32.totalorder %s989_s19, 2  ;;  %p52_p4 = scmp.ne.s32.totalorder %s700_s10, %s696_s9 }
   0xf   : > { %p799_p5 = por %p47_p2, %p46_p1  ;;  %p53_p6 = scmp.eq.s32.totalorder %s486_s17, 0 }
  0x10   : > { %s991_s19 = smov (%p32_p3, %s989_s19), 0  ;;  %p522_p8 = scmp.lt.s32.totalorder %s724_s16, 8 }
  0x11   : > { %971 = sst [smem:[#allocation11_spill]] %s991_s19  ;;  %p805_p7 = por %p53_p6, %p52_p4 }
  0x12   : > { %s34_s24 = ssub.s32 %s720_s15, %s991_s19  ;;  %s813_s26 = sand.u32 1, %s704_s11  }
  0x13   : > { %s972_s23 = scalar_select %p805_p7, 1, 0 }
  0x14   : > { %s36_s25 = sor.u32 %s35_s21, %s34_s24  ;;  %s490_s27 = sshll.u32 %s813_s26, 5 }
  0x15   : > { %p37_p9 = scmp.eq.s32.totalorder %s36_s25, 0  ;;  %s491_s28 = sshll.u32 %s720_s15, 4 }
  0x16   : > { %s139_s30 = sadd.s32 %s716_s14, %s491_s28  ;;  %s134_s4 = scalar_lea.vmem [#allocation5], %s490_s27 }
  0x17   : > { %s818_s29 = scalar_select %p37_p9, %s704_s11, %s39_s20  }
  0x18   : > { %s492_s3 = sshll.u32 %s139_s30, 7  ;;  %s142_s5 = sshll.u32 %s134_s4, 4  ;;  %s826_s5 = int_to_ptr.vmem [resolvable:$true] %s142_s5 }
  0x19   : > { %s973_s0 = sld [smem:[#allocation12_spill]]  ;;  %p832_p10 = pnand %p522_p8, %p799_p5 }
  0x1a   : > { %s131_s17 = scalar_lea.sflag [#allocation6], %s813_s26 }
  0x1b   : > { %p596_p13 = pneg %p832_p10 }
  0x1f   : > { %s824_s8 = scalar_lea.hbm %s973_s0, %s492_s3  ;;  %s599_s22 = scalar_lea.hbm %s973_s0, 4096 }
  0x20   : > { %s594_s20 = scalar_lea.hbm %s824_s8, 512  ;;  %p600_p2 = scmp.lt.u32.totalorder %s824_s8, %s973_s0 }
  0x21   : > { %p595_p12 = scmp.ne.s32.totalorder %s824_s8, %s594_s20  ;;  %p601_p3 = scmp.lt.u32.totalorder %s599_s22, %s594_s20 }
  0x22   : > { %p603_p5 = scmp.lt.u32.totalorder %s594_s20, %s824_s8 }
  0x23   : > { %p597_p0 = pnand %p596_p13, %p595_p12  ;;  %p602_p4 = por %p601_p3, %p600_p2 }
  0x25   : > { %p598_p1 = pneg %p597_p0  ;;  %p604_p6 = por %p603_p5, %p602_p4 }
  0x27   : > { %p605_p8 = pnand %p604_p6, %p598_p1 }
  0x29   : > { %608 = shalt.err (!%p605_p8)
}
  0x2a   : > { %s609_s28 = scalar_lea.vmem %s826_s5, 512  ;;  %s726_s30 = smov [#allocation5]  }
  0x2b   : > { %p610_p9 = scmp.ne.s32.totalorder %s826_s5, %s609_s28  ;;  %s614_s3 = sshll.u32 %s726_s30, 4  ;;  %s615_s3 = int_to_ptr.vmem [resolvable:$false] %s614_s3 }
  0x2c   : > { %s616_s4 = scalar_lea.vmem %s615_s3, 1024  ;;  %p617_p11 = scmp.lt.s32.totalorder %s826_s5, %s615_s3 }
  0x2d   : > { %p612_p12 = pnand %p610_p9, %p596_p13  ;;  %p618_p2 = scmp.lt.s32.totalorder %s616_s4, %s609_s28 }
  0x2f   : > { %p613_p0 = pneg %p612_p12  ;;  %p619_p3 = por %p618_p2, %p617_p11 }
  0x31   : > { %p620_p4 = pnand %p619_p3, %p613_p0 }
  0x33   : > { %623 = shalt.err (!%p620_p4)
}
  0x34   : > { %s727_s6 = smov 512   ;;  %s728_s7 = smov 128  }
  0x35   : > { %s729_s20 = smov 8   ;;  %p170_p11 = scmp.lt.s32.totalorder %s724_s16, 9 }
  0x36   : > { %518 = dma.hbm_to_vmem [thread:$0]  (!%p832_p10), %s824_s8, 512, %s826_s5, %s131_s17, %s727_s6, %s728_s7, %s729_s20  }
  0x37   : > { %s493_s21 = sshll.u32 %s813_s26, 3  ;;  %s494_s24 = sshll.u32 %s720_s15, 2 }
  0x38   : > { %p975_p1 = scmp.ge.s32.totalorder %s724_s16, 1  ;;  %s161_s25 = sadd.s32 %s716_s14, %s494_s24 }
  0x39   : > { %s156_s27 = scalar_lea.vmem [#allocation7], %s493_s21  ;;  %s495_s30 = sshll.u32 %s161_s25, 7 }
  0x3a   : > { %p870_p5 = pnand %p975_p1, %p170_p11  ;;  %s165_s28 = sshll.u32 %s156_s27, 4  ;;  %s875_s28 = int_to_ptr.vmem [resolvable:$true] %s165_s28 }
  0x3b   : > { %s163_s0 = scalar_lea.hbm %s965_s1, %s495_s30  ;;  %s153_s19 = scalar_lea.sflag [#allocation8], %s813_s26 }
  0x3c   : > { %s624_s5 = scalar_lea.hbm %s163_s0, 128  ;;  %s629_s6 = scalar_lea.hbm %s965_s1, 1024 }
  0x3d   : > { %p625_p6 = scmp.ne.s32.totalorder %s163_s0, %s624_s5  ;;  %p630_p12 = scmp.lt.u32.totalorder %s163_s0, %s965_s1 }
  0x3e   : > { %p631_p0 = scmp.lt.u32.totalorder %s629_s6, %s624_s5  ;;  %p633_p3 = scmp.lt.u32.totalorder %s624_s5, %s163_s0 }
  0x3f   : > { %p627_p8 = pnand %p625_p6, %p596_p13 }
  0x40   : > { %p632_p2 = por %p631_p0, %p630_p12 }
  0x41   : > { %p628_p9 = pneg %p627_p8 }
  0x42   : > { %p634_p4 = por %p633_p3, %p632_p2 }
  0x44   : > { %p635_p11 = pnand %p634_p4, %p628_p9 }
  0x46   : > { %638 = shalt.err (!%p635_p11)
}
  0x47   : > { %s639_s26 = scalar_lea.vmem %s875_s28, 128  ;;  %s730_s21 = smov [#allocation7]  }
  0x48   : > { %p640_p1 = scmp.ne.s32.totalorder %s875_s28, %s639_s26  ;;  %s644_s24 = sshll.u32 %s730_s21, 4  ;;  %s645_s24 = int_to_ptr.vmem [resolvable:$false] %s644_s24 }
  0x49   : > { %s646_s25 = scalar_lea.vmem %s645_s24, 256  ;;  %p647_p7 = scmp.lt.s32.totalorder %s875_s28, %s645_s24 }
  0x4a   : > { %p642_p6 = pnand %p640_p1, %p596_p13  ;;  %p648_p12 = scmp.lt.s32.totalorder %s646_s25, %s639_s26 }
  0x4c   : > { %p643_p8 = pneg %p642_p6  ;;  %p649_p0 = por %p648_p12, %p647_p7 }
  0x4e   : > { %p650_p2 = pnand %p649_p0, %p643_p8 }
  0x50   : > { %653 = shalt.err (!%p650_p2)
}
  0x51   : > { %521 = dma.hbm_to_vmem [thread:$0]  (!%p832_p10), %s163_s0, 128, %s875_s28, %s153_s19  }
  0x52   : > { %174 = sbr.rel (%p870_p5) target bundleno = 307 (0x133), region = 28  ;;  %s176_s27 = sand.u32 (!%p870_p5), 1, %s700_s10  }
  0x53   : > { %s497_s30 = sshll.u32 (!%p870_p5), %s176_s27, 5  ;;  %s177_s3 = scalar_lea.sflag (!%p870_p5), [#allocation6], %s176_s27 }
  0x54   : > { %s902_s4 = scalar_lea.vmem (!%p870_p5), [#allocation5], %s497_s30  ;;  %p977_p13 = scmp.ne.s32.totalorder (!%p870_p5), %s972_s23, 0 }
  0x59   : > { %687 = dma.done.wait (%p977_p13), %s177_s3, 512  }
  0x5a   : > { %689 = vsyncadd (%p977_p13), %s177_s3, 4294966784  ;;  %s498_s5 = sshll.u32 %s176_s27, 3  ;;  %s186_s9 = scalar_lea.sflag [#allocation8], %s176_s27 }
  0x5b   : > { %s189_s8 = scalar_lea.vmem [#allocation7], %s498_s5 }
  0x5c   : > { %691 = dma.done.wait (%p977_p13), %s186_s9, 128  }
  0x5d   : > { %693 = vsyncadd (%p977_p13), %s186_s9, 4294967168  ;;  %p214_p7 = scmp.lt.s32.totalorder %s712_s13, 1  ;;  %p500_p10 = scmp.ne.s32.totalorder %s708_s12, 0 }
  0x5e   : > { %v731_v0 = vmov (!%p500_p10), 0.0  }
  0x5f   : > { %s993_s13 = smov (!%p214_p7, %s712_s13), 1  ;;  %221 = sbr.rel (%p500_p10) target bundleno = 102 (0x66), region = 40 }
  0x60   : > { %s499_s0 = sshll.u32 %s993_s13, 2  ;;  %222 = vst [vmem:[#allocation2] sm:$0xf] (!%p500_p10), %v731_v0  ;;  %223 = vst [vmem:[#allocation3] sm:$0xf] (!%p500_p10), %v731_v0 }
  0x61   : > { %s917_s28 = scalar_lea.vmem %s966_s2, %s499_s0  ;;  %224 = vst [vmem:[#allocation4] sm:$0xf] (!%p500_p10), %v731_v0 }
  0x66 PF: > { %v920_v1 = vld [vmem:[%s189_s8] sm:$0xff]  ;;  %v732_v5 = vmov 0.0   ;;  %v504_v12 = vld [vmem:[%s902_s4 + $0x10] sm:$0xff]  ;;  %v506_v62 = vld [vmem:[%s902_s4 + $0x18] sm:$0xff]  ;;  %p508_p5 = scmp.ne.s32.totalorder %s708_s12, 3 }
  0x67   : > { %v226_v2 = vld [vmem:[%s902_s4] sm:$0xff]  ;;  %vm227_vm0 = vcmp.eq.s32.totalorder %v920_v1, 0  ;;  %v502_v7 = vld [vmem:[%s902_s4 + $0x8] sm:$0xff]  ;;  %vm260_vm1 = vcmp.eq.s32.totalorder %v920_v1, 1  ;;  %vm293_vm2 = vcmp.eq.s32.totalorder %v920_v1, 2  ;;  %v305_v23 = vrot.slane %v504_v12, 4 }
  0x68   : > { %v239_v3 = vrot.slane %v226_v2, 4  ;;  %v229_v4 = vsel %vm227_vm0, %v226_v2, 0.0  ;;  %v501_v6 = vsel %vm227_vm0, 1.0, %v732_v5  ;;  %v262_v11 = vsel %vm260_vm1, %v502_v7, 0.0  ;;  %v238_v36 = vld [vmem:[#allocation3] sm:$0x1] }
  0x69   : > { %v230_v8 = vrot.slane %v229_v4, 4  ;;  %v250_v10 = vrot.slane %v501_v6, 4  ;;  %v263_v13 = vrot.slane %v262_v11, 4  ;;  %v272_v14 = vrot.slane %v502_v7, 4  ;;  %v228_v41 = vld [vmem:[#allocation2] sm:$0x1] }
  0x6a   : > { %v240_v9 = vadd.f32 %v239_v3, %v226_v2  ;;  %v503_v15 = vsel %vm260_vm1, 1.0, %v732_v5  ;;  %v295_v22 = vsel %vm293_vm2, %v504_v12, 0.0  ;;  %v306_v31 = vadd.f32 %v504_v12, %v305_v23  ;;  %v247_v46 = vld [vmem:[#allocation4] sm:$0x1]  ;;  %v261_v54 = vld [vmem:[#allocation2 + $0x1] sm:$0x1] }
  0x6b   : > { %v231_v16 = vadd.f32 %v230_v8, %v229_v4  ;;  %v251_v18 = vadd.f32 %v501_v6, %v250_v10  ;;  %v283_v19 = vrot.slane %v503_v15, 4  ;;  %v264_v20 = vadd.f32 %v263_v13, %v262_v11  ;;  %v271_v55 = vld [vmem:[#allocation3 + $0x1] sm:$0x1]  ;;  %v280_v59 = vld [vmem:[#allocation4 + $0x1] sm:$0x1] }
  0x6c   : > { %v241_v17 = vrot.slane %v240_v9, 2  ;;  %v273_v21 = vadd.f32 %v502_v7, %v272_v14  ;;  %v296_v30 = vrot.slane %v295_v22, 4  ;;  %v307_v40 = vrot.slane %v306_v31, 2  ;;  %v304_v3 = vld [vmem:[#allocation3 + $0x2] sm:$0x1] }
  0x6d   : > { %v232_v24 = vrot.slane %v231_v16, 2  ;;  %v252_v26 = vrot.slane %v251_v18, 2  ;;  %v284_v27 = vadd.f32 %v503_v15, %v283_v19  ;;  %v265_v28 = vrot.slane %v264_v20, 2  ;;  %v294_v11 = vld [vmem:[#allocation2 + $0x2] sm:$0x1] }
  0x6e   : > { %v242_v25 = vadd.f32 %v241_v17, %v240_v9  ;;  %v274_v29 = vrot.slane %v273_v21, 2  ;;  %v297_v39 = vadd.f32 %v296_v30, %v295_v22  ;;  %v308_v50 = vadd.f32 %v307_v40, %v306_v31  ;;  %v346_v40 = vld [vmem:[#allocation4 + $0x3] sm:$0x1] }
  0x6f   : > { %v233_v32 = vadd.f32 %v232_v24, %v231_v16  ;;  %v253_v34 = vadd.f32 %v252_v26, %v251_v18  ;;  %v285_v35 = vrot.slane %v284_v27, 2  ;;  %v266_v37 = vadd.f32 %v265_v28, %v264_v20 }
  0x70   : > { %v243_v33 = vrot.slane %v242_v25, 1  ;;  %v275_v38 = vadd.f32 %v274_v29, %v273_v21  ;;  %v298_v49 = vrot.slane %v297_v39, 2  ;;  %v309_v61 = vrot.slane %v308_v50, 1 }
  0x71   : > { %v234_v42 = vrot.slane %v233_v32, 1  ;;  %v254_v44 = vrot.slane %v253_v34, 1  ;;  %v286_v45 = vadd.f32 %v285_v35, %v284_v27  ;;  %v267_v47 = vrot.slane %v266_v37, 1 }
  0x72   : > { %v244_v43 = vadd.f32 %v243_v33, %v242_v25  ;;  %v276_v48 = vrot.slane %v275_v38, 1  ;;  %v299_v60 = vadd.f32 %v298_v49, %v297_v39  ;;  %v505_v4 = vsel %vm293_vm2, 1.0, %v732_v5  ;;  %v313_v33 = vld [vmem:[#allocation4 + $0x2] sm:$0x1]  ;;  %v327_v39 = vld [vmem:[#allocation2 + $0x3] sm:$0x1] }
  0x73   : > { %v235_v51 = vadd.f32 %v234_v42, %v233_v32  ;;  %v255_v53 = vadd.f32 %v254_v44, %v253_v34  ;;  %v287_v56 = vrot.slane %v286_v45, 1  ;;  %v268_v57 = vadd.f32 %v267_v47, %v266_v37  ;;  %v337_v34 = vld [vmem:[#allocation3 + $0x3] sm:$0x1] }
  0x74   : > { %v245_v52 = vadd.f32 %v244_v43, %v238_v36  ;;  %v277_v58 = vadd.f32 %v276_v48, %v275_v38  ;;  %v300_v8 = vrot.slane %v299_v60, 1  ;;  %v310_v9 = vadd.f32 %v309_v61, %v308_v50 }
  0x75   : > { %v236_v63 = vadd.f32 %v235_v51, %v228_v41  ;;  %v256_v0 = vadd.f32 %v255_v53, %v247_v46  ;;  %v288_v2 = vadd.f32 %v287_v56, %v286_v45  ;;  %v269_v6 = vadd.f32 %v268_v57, %v261_v54 }
  0x76   : > { %246 = vst [vmem:[#allocation3] sm:$0x1] %v245_v52  ;;  %v278_v7 = vadd.f32 %v277_v58, %v271_v55  ;;  %v316_v12 = vrot.slane %v505_v4, 4  ;;  %vm326_vm3 = vcmp.eq.s32.totalorder %v920_v1, 3  ;;  %v338_v13 = vrot.slane %v506_v62, 4 }
  0x77   : > { %237 = vst [vmem:[#allocation2] sm:$0x1] %v236_v63  ;;  %257 = vst [vmem:[#allocation4] sm:$0x1] %v256_v0  ;;  %v289_v10 = vadd.f32 %v288_v2, %v280_v59  ;;  %v301_v14 = vadd.f32 %v300_v8, %v299_v60  ;;  %v311_v15 = vadd.f32 %v310_v9, %v304_v3  ;;  %v328_v16 = vsel %vm326_vm3, %v506_v62, 0.0 }
  0x78   : > { %270 = vst [vmem:[#allocation2 + $0x1] sm:$0x1] %v269_v6  ;;  %279 = vst [vmem:[#allocation3 + $0x1] sm:$0x1] %v278_v7  ;;  %v507_v17 = vsel %vm326_vm3, 1.0, %v732_v5  ;;  %v317_v18 = vadd.f32 %v505_v4, %v316_v12  ;;  %v329_v19 = vrot.slane %v328_v16, 4  ;;  %v339_v20 = vadd.f32 %v506_v62, %v338_v13 }
  0x79   : > { %290 = vst [vmem:[#allocation4 + $0x1] sm:$0x1] %v289_v10  ;;  %v349_v21 = vrot.slane %v507_v17, 4  ;;  %v302_v22 = vadd.f32 %v301_v14, %v294_v11  ;;  %312 = vst [vmem:[#allocation3 + $0x2] sm:$0x1] %v311_v15  ;;  %vm362_vm4 = vcmask (!%p508_p5), 1043456  }
  0x7a   : > { %v318_v23 = vrot.slane %v317_v18, 2  ;;  %v330_v24 = vadd.f32 %v329_v19, %v328_v16  ;;  %v340_v25 = vrot.slane %v339_v20, 2  ;;  %vm381_vm5 = vcmask (!%p508_p5), 3072  }
  0x7b   : > { %v350_v26 = vadd.f32 %v507_v17, %v349_v21  ;;  %303 = vst [vmem:[#allocation2 + $0x2] sm:$0x1] %v302_v22 }
  0x7c   : > { %v319_v1 = vadd.f32 %v318_v23, %v317_v18  ;;  %v331_v27 = vrot.slane %v330_v24, 2  ;;  %v341_v28 = vadd.f32 %v340_v25, %v339_v20 }
  0x7d   : > { %v351_v29 = vrot.slane %v350_v26, 2 }
  0x7e   : > { %v320_v30 = vrot.slane %v319_v1, 1  ;;  %v332_v31 = vadd.f32 %v331_v27, %v330_v24  ;;  %v342_v32 = vrot.slane %v341_v28, 1 }
  0x7f   : > { %v352_v5 = vadd.f32 %v351_v29, %v350_v26 }
  0x80   : > { %v321_v35 = vadd.f32 %v320_v30, %v319_v1  ;;  %v333_v36 = vrot.slane %v332_v31, 1  ;;  %v343_v37 = vadd.f32 %v342_v32, %v341_v28 }
  0x81   : > { %v353_v38 = vrot.slane %v352_v5, 1  ;;  %360 = sbr.rel (%p508_p5) target bundleno = 307 (0x133), region = 44 }
  0x82   : > { %v322_v41 = vadd.f32 %v321_v35, %v313_v33  ;;  %v334_v42 = vadd.f32 %v333_v36, %v332_v31  ;;  %v344_v43 = vadd.f32 %v343_v37, %v337_v34 }
  0x83   : > { %v354_v44 = vadd.f32 %v353_v38, %v352_v5 }
  0x84   : > { %323 = vst [vmem:[#allocation4 + $0x2] sm:$0x1] %v322_v41  ;;  %v335_v45 = vadd.f32 %v334_v42, %v327_v39  ;;  %345 = vst [vmem:[#allocation3 + $0x3] sm:$0x1] %v344_v43 }
  0x85   : > { %v355_v46 = vadd.f32 %v354_v44, %v346_v40 }
  0x86   : > { %336 = vst [vmem:[#allocation2 + $0x3] sm:$0x1] %v335_v45 }
  0x87   : > { %356 = vst [vmem:[#allocation4 + $0x3] sm:$0x1] %v355_v46 }
  0x8b   : > { %v366_v47 = vld [vmem:[#allocation3] sm:$0xf] }
  0x8c   : > { %v367_v49 = vsel %vm362_vm4, %v366_v47, 0.0 }
  0x8d   : > { %v361_v50 = vld [vmem:[#allocation2] sm:$0xf]  ;;  %368 = vadd.xlane.f32.xlu0 %v367_v49 }
  0x8e   : > { %v370_v48 = vld [vmem:[#allocation4] sm:$0xf]  ;;  %v363_v51 = vsel %vm362_vm4, %v361_v50, 0.0 }
  0x8f   : > { %v371_v52 = vsel %vm362_vm4, %v370_v48, 0.0  ;;  %364 = vadd.xlane.f32.xlu1 %v363_v51 }
  0x91   : > { %372 = vadd.xlane.f32.xlu0 %v371_v52 }
 0x11a   : > { %v369_v53 = vpop.xlane.xlu0 %368 }
 0x11c   : > { %v365_v58 = vpop.xlane.xlu1 %364 }
 0x11d   : > { %v377_v59 = vmul.f32 2.0, %v365_v58 }
 0x11e   : > { %v373_v54 = vpop.xlane.xlu0 %372 }
 0x11f   : > { %v374_v55 = vadd.f32 %v373_v54, %v369_v53  ;;  %v378_v60 = vadd.f32 1.0, %v377_v59 }
 0x121   : > { %v375_v56 = vadd.f32 1.0, %v374_v55 }
 0x123   : > { %v376_v57 = vmax.f32 %v375_v56, 1e-08 }
 0x125   : > { %592 = vrcp.f32 %v376_v57 }
 0x12f   : > { %v593_v61 = vpop.eup %592 }
 0x130   : > { %v380_v62 = vmul.f32 %v593_v61, %v378_v60 }
 0x132   : > { %382 = vst.msk [vmem:[%s917_s28] sm:$0xf] %vm381_vm5, %v380_v62 }
 0x133 PF: > { %s18_s16 = sadd.s32 1, %s724_s16   ;;  %s978_s23 = sld [smem:[#allocation11_spill]] }
 0x134   : > { %p15_p9 = scmp.ge.s32.totalorder %s18_s16, 10   ;;  %s979_s9 = smov %s700_s10 }
 0x135   : > { %s980_s10 = smov %s704_s11  ;;  %s981_s11 = smov %s818_s29 }
 0x136   : > { %s982_s12 = smov %s716_s14  ;;  %s983_s13 = smov %s720_s15 }
 0x137   : > { %s984_s14 = smov %s987_s18  ;;  %17 = sbr.rel (!%p15_p9) target bundleno = 9 (0x9), region = 92 }
 0x139   : > { %s985_s15 = smov %s978_s23 }
 0x13e   :  { %402 = vsyncpa [#allocation6], 1 }
 0x13f   :  { %404 = vsyncpa [#allocation6 + $0x1], 1 }
 0x140   :  { %405 = vsyncpa [#allocation8], 1 }
 0x141   :  { %407 = vsyncpa [#allocation8 + $0x1], 1 }

</bundles_post_ra>
